<compile_context>
chip_gen: v6e
topology: v6e:2x2x1
jax: 0.10.0
libtpu: 0.0.40
codegen_flags: <defaults>
</compile_context>

<pallas_src>
import functools
import math

import jax
import jax.numpy as jnp
from jax.experimental import pallas as pl
from jax.experimental.pallas import tpu as pltpu


def _round_up(a, b):
    return ((a + b - 1) // b) * b


def _tpu_config():
    """Returns (tensorcores_per_device, vmem_limit_bytes); conservative on unknowns."""
    try:
        kind = jax.devices()[0].device_kind.lower()
    except Exception:
        kind = ""
    single_tc = any(s in kind for s in ("v5 lite", "v5e", "v5litepod", "v6 lite", "v6e"))
    if single_tc:
        return 1, 64 * 1024 * 1024      # 128 MiB physical VMEM on v5e/v6e
    return 2, 40 * 1024 * 1024          # v7x / unknown: assume 2 TCs, 64 MiB physical


def _lml_kernel(x_ref, o_ref, *, N, nx, eps, n_iter, branch, nx_axis, margin):
    """Bracketing search for nu with sum_k sigmoid(x+nu) == N; y = sigmoid(x+nu).

    x tile shape (R, C).  nu / bracket values are (R, 1) when nx_axis == 1
    (row-major layout) or (1, C) when nx_axis == 0 (transposed, batch-on-lanes).
    """
    x = x_ref[...]                                        # (R, C) f32

    # Analytic bracket from the row max/min (replaces host-side top_k):
    #   fs(nu_lo) <= nx*sigmoid(-margin) - N < 0   and   fs(nu_up) >= nx - 0.25 - N >= 0
    # so the invariant fs(lo) < 0 <= fs(up) holds from the start and the
    # reference's degenerate "no negative candidate" branch is unreachable.
    nu_lo = -jnp.max(x, axis=nx_axis, keepdims=True) - margin
    nu_up = -jnp.min(x, axis=nx_axis, keepdims=True) + margin

    target = float(2 * N - nx)            # tanh-space threshold for "fs < 0"
    inv_bm1 = 1.0 / float(branch - 1)

    def refine(lo, up, active):
        """One bracket refinement; rows with active == False are left untouched."""
        r = up - lo
        # Count candidates with fs < 0.  The j = branch-1 candidate (== nu_up)
        # always has fs >= 0 by the bracket invariant, so it is skipped.
        neg_count = jnp.zeros_like(lo)
        for j in range(branch - 1):
            nu_j = lo + r * (float(j) * inv_bm1)
            tsum = jnp.sum(jnp.tanh(0.5 * (x + nu_j)), axis=nx_axis, keepdims=True)
            neg_count = neg_count + (tsum < target).astype(jnp.float32)
        # candidate 0 (== nu_lo) always has fs < 0 => neg_count >= 1; clamp anyway.
        i_low = jnp.maximum(neg_count - 1.0, 0.0)
        new_lo = lo + r * (i_low * inv_bm1)
        new_up = lo + r * ((i_low + 1.0) * inv_bm1)
        new_lo = jnp.where(active, new_lo, lo)
        new_up = jnp.where(active, new_up, up)
        return new_lo, new_up, r

    def cond(carry):
        _lo, _up, _rt, it, wmax = carry
        return jnp.logical_and(it < n_iter, wmax > eps)

    def body(carry):
        lo, up, _rt, it, _w = carry
        # Two refinements per body: the scalar convergence check in `cond` only
        # serializes the EUP pipeline every other refinement.
        act1 = (up - lo) > eps
        lo, up, r1 = refine(lo, up, act1)
        do2 = (it + 1) < n_iter
        act2 = jnp.logical_and((up - lo) > eps, do2)
        lo, up, r2 = refine(lo, up, act2)
        r_top = jnp.where(do2, r2, r1)    # widths at the top of the last refinement
        wmax = jnp.max(up - lo)           # scalar convergence metric
        return (lo, up, r_top, it + 2, wmax)

    r0 = nu_up - nu_lo
    carry0 = (nu_lo, nu_up, r0, jnp.int32(0), jnp.max(r0))
    nu_lo, nu_up, r_top, _it, _w = jax.lax.while_loop(cond, body, carry0)

    # Match the reference's final `r`: converged rows use their frozen bracket
    # width (-> midpoint); rows still active when n_iter is exhausted use the
    # width from the top of their last refinement.
    width = nu_up - nu_lo
    r_fin = jnp.where(width <= eps, width, r_top)
    nu = nu_lo + 0.5 * r_fin
    o_ref[...] = 0.5 * jnp.tanh(0.5 * (x + nu)) + 0.5     # == sigmoid(x + nu)
    # TODO(synk): bf16 search-phase tanh (2x EUP rate on v6e/v7x) intentionally
    # skipped: a sign flip near fs==0 breaks the bracket invariant and can leave
    # |sum(y) - N| at the bf16 accumulation error.


def _lml_small_nx(x, N, eps, n_iter, branch, margin):
    """nx < 128: lane-dense layout -- batch mapped to lanes (x transposed)."""
    n_batch, nx = x.shape
    ncores, vmem_limit = _tpu_config()
    Bp = _round_up(n_batch, 128)
    if ncores > 1:
        # Oversubscribe the grid (>= ~4 steps per core when the batch allows) so
        # data-dependent per-tile trip counts cannot idle one TensorCore.
        TL = min(2048, max(128, (Bp // (4 * ncores)) // 128 * 128))
    else:
        TL = min(Bp, 4096)               # single TC: largest lane tile (<= ~2 MiB)
    Bp = _round_up(n_batch, TL)
    x_t = jnp.pad(x.T, ((0, 0), (0, Bp - n_batch)))       # (nx, Bp); pad lanes are free
    # TODO(synk): the two host-side transposes could be folded into the kernel,
    # but they are a tiny fraction of ~(branch-1)*iters tanh per element.

    kernel = functools.partial(
        _lml_kernel, N=int(N), nx=int(nx), eps=float(eps), n_iter=int(n_iter),
        branch=int(branch), nx_axis=0, margin=float(margin))

    y_t = pl.pallas_call(
        kernel,
        out_shape=jax.ShapeDtypeStruct((nx, Bp), jnp.float32),
        grid=(Bp // TL,),
        in_specs=[pl.BlockSpec((nx, TL), lambda i: (0, i))],
        out_specs=pl.BlockSpec((nx, TL), lambda i: (0, i)),
        compiler_params=pltpu.CompilerParams(
            dimension_semantics=("parallel",),
            vmem_limit_bytes=vmem_limit),
    )(x_t)
    return y_t[:, :n_batch].T


def _lml_large_nx(x, N, eps, n_iter, branch, margin):
    """nx >= 128: rows on sublanes, full nx per block."""
    n_batch, nx = x.shape
    ncores, vmem_limit = _tpu_config()
    # Compute-bound kernel: tile size mainly amortizes per-step overhead.  Big
    # (~4 MiB) row tiles on single-TC chips; ~2 MiB + oversubscribed grid on 2-TC.
    tile_bytes = (2 if ncores > 1 else 4) * 1024 * 1024
    TB = max(8, min(1024, (tile_bytes // (4 * nx)) // 8 * 8))
    TB = min(TB, _round_up(n_batch, 8))
    if ncores > 1:
        TB = min(TB, max(8, (_round_up(n_batch, 8) // (4 * ncores)) // 8 * 8))
    Bp = _round_up(n_batch, TB)
    x_p = jnp.pad(x, ((0, Bp - n_batch), (0, 0)))         # pad rows are free

    kernel = functools.partial(
        _lml_kernel, N=int(N), nx=int(nx), eps=float(eps), n_iter=int(n_iter),
        branch=int(branch), nx_axis=1, margin=float(margin))

    y_p = pl.pallas_call(
        kernel,
        out_shape=jax.ShapeDtypeStruct((Bp, nx), jnp.float32),
        grid=(Bp // TB,),
        in_specs=[pl.BlockSpec((TB, nx), lambda i: (i, 0))],
        out_specs=pl.BlockSpec((TB, nx), lambda i: (i, 0)),
        compiler_params=pltpu.CompilerParams(
            dimension_semantics=("parallel",),
            vmem_limit_bytes=vmem_limit),
    )(x_p)
    return y_p[:n_batch]


def lml_forward(x, N, eps=1e-4, n_iter=100, branch=None, verbose=0):
    """Forward pass of the LML module (verbose ignored: reference only prints)."""
    del verbose
    if branch is None:
        # Reference defaults to 10 (CPU) / 100 (CUDA).  The search is EUP (tanh)
        # bound on TPU and total work ~ (branch-1)/log(branch-1), minimized near
        # 4-5; any branch >= 2 converges to the same nu within eps.
        branch = 5

    x = jnp.asarray(x, jnp.float32)
    single = x.ndim == 1
    if single:
        x = x[None, :]
    assert x.ndim == 2
    n_batch, nx = x.shape

    if nx <= N:
        y = (1.0 - 1e-5) * jnp.ones((n_batch, nx), dtype=x.dtype)
        return y[0] if single else y

    # Bracket margin: sigmoid(-margin) * nx <= 0.25 guarantees fs(lo) < 0 <= fs(up)
    # for every row (the reference's fixed +-7 only guarantees this for nx < ~1000).
    margin = max(7.0, math.log(4.0 * nx))

    if nx < 128:
        y = _lml_small_nx(x, N, eps, n_iter, branch, margin)
    else:
        y = _lml_large_nx(x, N, eps, n_iter, branch, margin)
    return y[0] if single else y


class LML:
    """JAX/Pallas analogue of the PyTorch LML module (forward only)."""

    def __init__(self, N, eps=1e-4, n_iter=100, branch=None, verbose=0):
        self.N = N
        self.eps = eps
        self.n_iter = n_iter
        self.branch = branch
        self.verbose = verbose

    def __call__(self, x):
        return lml_forward(x, self.N, self.eps, self.n_iter, self.branch,
                           self.verbose)


if __name__ == "__main__":
    key = jax.random.PRNGKey(0)
    n_batch, nx, N = 4, 16, 3
    x = jax.random.normal(key, (n_batch, nx), dtype=jnp.float32)

    lml = LML(N=N, eps=1e-4, n_iter=100, branch=None, verbose=0)
    y = jax.block_until_ready(lml(x))

    # each row's soft-selection should sum to ~N and lie in [0, 1]
    assert y.shape == (n_batch, nx)
    assert bool(jnp.all(jnp.abs(jnp.sum(y, axis=1) - N) < 0.05))
    assert bool(jnp.all((y >= 0.0) & (y <= 1.0)))

    # 1-D input path and the nx <= N short-circuit
    y1 = jax.block_until_ready(lml(x[0]))
    assert y1.shape == (nx,)
    y2 = jax.block_until_ready(LML(N=nx)(x))
    assert bool(jnp.all(jnp.abs(y2 - (1.0 - 1e-5)) < 1e-6))

    # row-major (nx >= 128) path
    x_big = jax.random.normal(jax.random.PRNGKey(1), (8, 256), dtype=jnp.float32)
    y_big = jax.block_until_ready(LML(N=5)(x_big))
    assert y_big.shape == (8, 256)
    assert bool(jnp.all(jnp.abs(jnp.sum(y_big, axis=1) - 5.0) < 0.05))

    print("KERNEL_OK")
</pallas_src>

<mosaic_0001>
module attributes {stable_mosaic.version = 11 : i64} {
  func.func @_lml_kernel(%arg0: i32, %arg1: memref<16x128xf32, #tpu.memory_space<vmem>>, %arg2: memref<16x128xf32, #tpu.memory_space<vmem>>) attributes {dimension_semantics = [#tpu.dimension_semantics<parallel>], iteration_bounds = array<i64: 1>, scalar_prefetch = 0 : i64, scratch_operands = 0 : i64, tpu.core_type = #tpu.core_type<tc>, window_params = [{transform_indices = @transform_0, window_bounds = array<i64: 16, 128>}, {transform_indices = @transform_1, window_bounds = array<i64: 16, 128>}]} {
    %c0 = arith.constant 0 : index
    %c0_0 = arith.constant 0 : index
    %0 = vector.load %arg1[%c0, %c0_0] : memref<16x128xf32, #tpu.memory_space<vmem>>, vector<16x128xf32>
    %cst = arith.constant dense<0xFF800000> : vector<128xf32>
    %1 = vector.multi_reduction <maximumf>, %0, %cst [0] : vector<16x128xf32> to vector<128xf32>
    %2 = vector.shape_cast %1 : vector<128xf32> to vector<1x128xf32>
    %cst_1 = arith.constant 0.000000e+00 : f32
    %3 = vector.broadcast %cst_1 : f32 to vector<1x128xf32>
    %4 = arith.subf %3, %2 : vector<1x128xf32>
    %cst_2 = arith.constant 7.000000e+00 : f32
    %5 = vector.broadcast %cst_2 : f32 to vector<1x128xf32>
    %6 = arith.subf %4, %5 : vector<1x128xf32>
    %cst_3 = arith.constant dense<0x7F800000> : vector<128xf32>
    %7 = vector.multi_reduction <minimumf>, %0, %cst_3 [0] : vector<16x128xf32> to vector<128xf32>
    %8 = vector.shape_cast %7 : vector<128xf32> to vector<1x128xf32>
    %cst_4 = arith.constant 0.000000e+00 : f32
    %9 = vector.broadcast %cst_4 : f32 to vector<1x128xf32>
    %10 = arith.subf %9, %8 : vector<1x128xf32>
    %cst_5 = arith.constant 7.000000e+00 : f32
    %11 = vector.broadcast %cst_5 : f32 to vector<1x128xf32>
    %12 = arith.addf %10, %11 : vector<1x128xf32>
    %13 = arith.subf %12, %6 : vector<1x128xf32>
    %14 = vector.shape_cast %13 : vector<1x128xf32> to vector<1x1x128xf32>
    %cst_6 = arith.constant dense<0xFF800000> : vector<1xf32>
    %15 = vector.multi_reduction <maximumf>, %14, %cst_6 [1, 2] : vector<1x1x128xf32> to vector<1xf32>
    %16 = vector.shape_cast %15 : vector<1xf32> to vector<1x1x1xf32>
    %17 = vector.extract %16[0, 0, 0] : f32 from vector<1x1x1xf32>
    %c0_i32 = arith.constant 0 : i32
    %18:5 = scf.while (%arg3 = %6, %arg4 = %12, %arg5 = %13, %arg6 = %c0_i32, %arg7 = %17) : (vector<1x128xf32>, vector<1x128xf32>, vector<1x128xf32>, i32, f32) -> (vector<1x128xf32>, vector<1x128xf32>, vector<1x128xf32>, i32, f32) {
      %c100_i32 = arith.constant 100 : i32
      %36 = arith.cmpi slt, %arg6, %c100_i32 : i32
      %cst_14 = arith.constant 9.99999974E-5 : f32
      %37 = arith.cmpf ogt, %arg7, %cst_14 : f32
      %38 = arith.andi %36, %37 : i1
      scf.condition(%38) %arg3, %arg4, %arg5, %arg6, %arg7 : vector<1x128xf32>, vector<1x128xf32>, vector<1x128xf32>, i32, f32
    } do {
    ^bb0(%arg3: vector<1x128xf32>, %arg4: vector<1x128xf32>, %arg5: vector<1x128xf32>, %arg6: i32, %arg7: f32):
      %36 = arith.subf %arg4, %arg3 : vector<1x128xf32>
      %cst_14 = arith.constant 9.99999974E-5 : f32
      %37 = vector.broadcast %cst_14 : f32 to vector<1x128xf32>
      %38 = arith.cmpf ogt, %36, %37 : vector<1x128xf32>
      %39 = arith.subf %arg4, %arg3 : vector<1x128xf32>
      %cst_15 = arith.constant 0.000000e+00 : f32
      %40 = vector.broadcast %cst_15 : f32 to vector<1x128xf32>
      %cst_16 = arith.constant 0.000000e+00 : f32
      %41 = vector.broadcast %cst_16 : f32 to vector<1x128xf32>
      %42 = arith.mulf %39, %41 : vector<1x128xf32>
      %43 = arith.addf %arg3, %42 : vector<1x128xf32>
      %44 = vector.broadcast %43 : vector<1x128xf32> to vector<16x128xf32>
      %45 = arith.addf %0, %44 : vector<16x128xf32>
      %cst_17 = arith.constant 5.000000e-01 : f32
      %46 = vector.broadcast %cst_17 : f32 to vector<16x128xf32>
      %47 = arith.mulf %46, %45 : vector<16x128xf32>
      %48 = math.tanh %47 : vector<16x128xf32>
      %cst_18 = arith.constant dense<0.000000e+00> : vector<128xf32>
      %49 = vector.multi_reduction <add>, %48, %cst_18 [0] : vector<16x128xf32> to vector<128xf32>
      %50 = vector.shape_cast %49 : vector<128xf32> to vector<1x128xf32>
      %cst_19 = arith.constant -1.000000e+01 : f32
      %51 = vector.broadcast %cst_19 : f32 to vector<1x128xf32>
      %52 = arith.cmpf olt, %50, %51 : vector<1x128xf32>
      %53 = arith.extui %52 : vector<1x128xi1> to vector<1x128xi32>
      %54 = arith.sitofp %53 : vector<1x128xi32> to vector<1x128xf32>
      %55 = arith.addf %40, %54 : vector<1x128xf32>
      %cst_20 = arith.constant 2.500000e-01 : f32
      %56 = vector.broadcast %cst_20 : f32 to vector<1x128xf32>
      %57 = arith.mulf %39, %56 : vector<1x128xf32>
      %58 = arith.addf %arg3, %57 : vector<1x128xf32>
      %59 = vector.broadcast %58 : vector<1x128xf32> to vector<16x128xf32>
      %60 = arith.addf %0, %59 : vector<16x128xf32>
      %cst_21 = arith.constant 5.000000e-01 : f32
      %61 = vector.broadcast %cst_21 : f32 to vector<16x128xf32>
      %62 = arith.mulf %61, %60 : vector<16x128xf32>
      %63 = math.tanh %62 : vector<16x128xf32>
      %cst_22 = arith.constant dense<0.000000e+00> : vector<128xf32>
      %64 = vector.multi_reduction <add>, %63, %cst_22 [0] : vector<16x128xf32> to vector<128xf32>
      %65 = vector.shape_cast %64 : vector<128xf32> to vector<1x128xf32>
      %cst_23 = arith.constant -1.000000e+01 : f32
      %66 = vector.broadcast %cst_23 : f32 to vector<1x128xf32>
      %67 = arith.cmpf olt, %65, %66 : vector<1x128xf32>
      %68 = arith.extui %67 : vector<1x128xi1> to vector<1x128xi32>
      %69 = arith.sitofp %68 : vector<1x128xi32> to vector<1x128xf32>
      %70 = arith.addf %55, %69 : vector<1x128xf32>
      %cst_24 = arith.constant 5.000000e-01 : f32
      %71 = vector.broadcast %cst_24 : f32 to vector<1x128xf32>
      %72 = arith.mulf %39, %71 : vector<1x128xf32>
      %73 = arith.addf %arg3, %72 : vector<1x128xf32>
      %74 = vector.broadcast %73 : vector<1x128xf32> to vector<16x128xf32>
      %75 = arith.addf %0, %74 : vector<16x128xf32>
      %cst_25 = arith.constant 5.000000e-01 : f32
      %76 = vector.broadcast %cst_25 : f32 to vector<16x128xf32>
      %77 = arith.mulf %76, %75 : vector<16x128xf32>
      %78 = math.tanh %77 : vector<16x128xf32>
      %cst_26 = arith.constant dense<0.000000e+00> : vector<128xf32>
      %79 = vector.multi_reduction <add>, %78, %cst_26 [0] : vector<16x128xf32> to vector<128xf32>
      %80 = vector.shape_cast %79 : vector<128xf32> to vector<1x128xf32>
      %cst_27 = arith.constant -1.000000e+01 : f32
      %81 = vector.broadcast %cst_27 : f32 to vector<1x128xf32>
      %82 = arith.cmpf olt, %80, %81 : vector<1x128xf32>
      %83 = arith.extui %82 : vector<1x128xi1> to vector<1x128xi32>
      %84 = arith.sitofp %83 : vector<1x128xi32> to vector<1x128xf32>
      %85 = arith.addf %70, %84 : vector<1x128xf32>
      %cst_28 = arith.constant 7.500000e-01 : f32
      %86 = vector.broadcast %cst_28 : f32 to vector<1x128xf32>
      %87 = arith.mulf %39, %86 : vector<1x128xf32>
      %88 = arith.addf %arg3, %87 : vector<1x128xf32>
      %89 = vector.broadcast %88 : vector<1x128xf32> to vector<16x128xf32>
      %90 = arith.addf %0, %89 : vector<16x128xf32>
      %cst_29 = arith.constant 5.000000e-01 : f32
      %91 = vector.broadcast %cst_29 : f32 to vector<16x128xf32>
      %92 = arith.mulf %91, %90 : vector<16x128xf32>
      %93 = math.tanh %92 : vector<16x128xf32>
      %cst_30 = arith.constant dense<0.000000e+00> : vector<128xf32>
      %94 = vector.multi_reduction <add>, %93, %cst_30 [0] : vector<16x128xf32> to vector<128xf32>
      %95 = vector.shape_cast %94 : vector<128xf32> to vector<1x128xf32>
      %cst_31 = arith.constant -1.000000e+01 : f32
      %96 = vector.broadcast %cst_31 : f32 to vector<1x128xf32>
      %97 = arith.cmpf olt, %95, %96 : vector<1x128xf32>
      %98 = arith.extui %97 : vector<1x128xi1> to vector<1x128xi32>
      %99 = arith.sitofp %98 : vector<1x128xi32> to vector<1x128xf32>
      %100 = arith.addf %85, %99 : vector<1x128xf32>
      %cst_32 = arith.constant 1.000000e+00 : f32
      %101 = vector.broadcast %cst_32 : f32 to vector<1x128xf32>
      %102 = arith.subf %100, %101 : vector<1x128xf32>
      %cst_33 = arith.constant 0.000000e+00 : f32
      %103 = vector.broadcast %cst_33 : f32 to vector<1x128xf32>
      %104 = arith.maximumf %102, %103 : vector<1x128xf32>
      %cst_34 = arith.constant 2.500000e-01 : f32
      %105 = vector.broadcast %cst_34 : f32 to vector<1x128xf32>
      %106 = arith.mulf %104, %105 : vector<1x128xf32>
      %107 = arith.mulf %39, %106 : vector<1x128xf32>
      %108 = arith.addf %arg3, %107 : vector<1x128xf32>
      %cst_35 = arith.constant 1.000000e+00 : f32
      %109 = vector.broadcast %cst_35 : f32 to vector<1x128xf32>
      %110 = arith.addf %104, %109 : vector<1x128xf32>
      %cst_36 = arith.constant 2.500000e-01 : f32
      %111 = vector.broadcast %cst_36 : f32 to vector<1x128xf32>
      %112 = arith.mulf %110, %111 : vector<1x128xf32>
      %113 = arith.mulf %39, %112 : vector<1x128xf32>
      %114 = arith.addf %arg3, %113 : vector<1x128xf32>
      %115 = arith.select %38, %108, %arg3 : vector<1x128xi1>, vector<1x128xf32>
      %116 = arith.select %38, %114, %arg4 : vector<1x128xi1>, vector<1x128xf32>
      %c1_i32 = arith.constant 1 : i32
      %117 = arith.addi %arg6, %c1_i32 : i32
      %c100_i32 = arith.constant 100 : i32
      %118 = arith.cmpi slt, %117, %c100_i32 : i32
      %119 = arith.subf %116, %115 : vector<1x128xf32>
      %cst_37 = arith.constant 9.99999974E-5 : f32
      %120 = vector.broadcast %cst_37 : f32 to vector<1x128xf32>
      %121 = arith.cmpf ogt, %119, %120 : vector<1x128xf32>
      %122 = vector.broadcast %118 : i1 to vector<1x128xi1>
      %123 = arith.andi %121, %122 : vector<1x128xi1>
      %124 = arith.subf %116, %115 : vector<1x128xf32>
      %cst_38 = arith.constant 0.000000e+00 : f32
      %125 = vector.broadcast %cst_38 : f32 to vector<1x128xf32>
      %cst_39 = arith.constant 0.000000e+00 : f32
      %126 = vector.broadcast %cst_39 : f32 to vector<1x128xf32>
      %127 = arith.mulf %124, %126 : vector<1x128xf32>
      %128 = arith.addf %115, %127 : vector<1x128xf32>
      %129 = vector.broadcast %128 : vector<1x128xf32> to vector<16x128xf32>
      %130 = arith.addf %0, %129 : vector<16x128xf32>
      %cst_40 = arith.constant 5.000000e-01 : f32
      %131 = vector.broadcast %cst_40 : f32 to vector<16x128xf32>
      %132 = arith.mulf %131, %130 : vector<16x128xf32>
      %133 = math.tanh %132 : vector<16x128xf32>
      %cst_41 = arith.constant dense<0.000000e+00> : vector<128xf32>
      %134 = vector.multi_reduction <add>, %133, %cst_41 [0] : vector<16x128xf32> to vector<128xf32>
      %135 = vector.shape_cast %134 : vector<128xf32> to vector<1x128xf32>
      %cst_42 = arith.constant -1.000000e+01 : f32
      %136 = vector.broadcast %cst_42 : f32 to vector<1x128xf32>
      %137 = arith.cmpf olt, %135, %136 : vector<1x128xf32>
      %138 = arith.extui %137 : vector<1x128xi1> to vector<1x128xi32>
      %139 = arith.sitofp %138 : vector<1x128xi32> to vector<1x128xf32>
      %140 = arith.addf %125, %139 : vector<1x128xf32>
      %cst_43 = arith.constant 2.500000e-01 : f32
      %141 = vector.broadcast %cst_43 : f32 to vector<1x128xf32>
      %142 = arith.mulf %124, %141 : vector<1x128xf32>
      %143 = arith.addf %115, %142 : vector<1x128xf32>
      %144 = vector.broadcast %143 : vector<1x128xf32> to vector<16x128xf32>
      %145 = arith.addf %0, %144 : vector<16x128xf32>
      %cst_44 = arith.constant 5.000000e-01 : f32
      %146 = vector.broadcast %cst_44 : f32 to vector<16x128xf32>
      %147 = arith.mulf %146, %145 : vector<16x128xf32>
      %148 = math.tanh %147 : vector<16x128xf32>
      %cst_45 = arith.constant dense<0.000000e+00> : vector<128xf32>
      %149 = vector.multi_reduction <add>, %148, %cst_45 [0] : vector<16x128xf32> to vector<128xf32>
      %150 = vector.shape_cast %149 : vector<128xf32> to vector<1x128xf32>
      %cst_46 = arith.constant -1.000000e+01 : f32
      %151 = vector.broadcast %cst_46 : f32 to vector<1x128xf32>
      %152 = arith.cmpf olt, %150, %151 : vector<1x128xf32>
      %153 = arith.extui %152 : vector<1x128xi1> to vector<1x128xi32>
      %154 = arith.sitofp %153 : vector<1x128xi32> to vector<1x128xf32>
      %155 = arith.addf %140, %154 : vector<1x128xf32>
      %cst_47 = arith.constant 5.000000e-01 : f32
      %156 = vector.broadcast %cst_47 : f32 to vector<1x128xf32>
      %157 = arith.mulf %124, %156 : vector<1x128xf32>
      %158 = arith.addf %115, %157 : vector<1x128xf32>
      %159 = vector.broadcast %158 : vector<1x128xf32> to vector<16x128xf32>
      %160 = arith.addf %0, %159 : vector<16x128xf32>
      %cst_48 = arith.constant 5.000000e-01 : f32
      %161 = vector.broadcast %cst_48 : f32 to vector<16x128xf32>
      %162 = arith.mulf %161, %160 : vector<16x128xf32>
      %163 = math.tanh %162 : vector<16x128xf32>
      %cst_49 = arith.constant dense<0.000000e+00> : vector<128xf32>
      %164 = vector.multi_reduction <add>, %163, %cst_49 [0] : vector<16x128xf32> to vector<128xf32>
      %165 = vector.shape_cast %164 : vector<128xf32> to vector<1x128xf32>
      %cst_50 = arith.constant -1.000000e+01 : f32
      %166 = vector.broadcast %cst_50 : f32 to vector<1x128xf32>
      %167 = arith.cmpf olt, %165, %166 : vector<1x128xf32>
      %168 = arith.extui %167 : vector<1x128xi1> to vector<1x128xi32>
      %169 = arith.sitofp %168 : vector<1x128xi32> to vector<1x128xf32>
      %170 = arith.addf %155, %169 : vector<1x128xf32>
      %cst_51 = arith.constant 7.500000e-01 : f32
      %171 = vector.broadcast %cst_51 : f32 to vector<1x128xf32>
      %172 = arith.mulf %124, %171 : vector<1x128xf32>
      %173 = arith.addf %115, %172 : vector<1x128xf32>
      %174 = vector.broadcast %173 : vector<1x128xf32> to vector<16x128xf32>
      %175 = arith.addf %0, %174 : vector<16x128xf32>
      %cst_52 = arith.constant 5.000000e-01 : f32
      %176 = vector.broadcast %cst_52 : f32 to vector<16x128xf32>
      %177 = arith.mulf %176, %175 : vector<16x128xf32>
      %178 = math.tanh %177 : vector<16x128xf32>
      %cst_53 = arith.constant dense<0.000000e+00> : vector<128xf32>
      %179 = vector.multi_reduction <add>, %178, %cst_53 [0] : vector<16x128xf32> to vector<128xf32>
      %180 = vector.shape_cast %179 : vector<128xf32> to vector<1x128xf32>
      %cst_54 = arith.constant -1.000000e+01 : f32
      %181 = vector.broadcast %cst_54 : f32 to vector<1x128xf32>
      %182 = arith.cmpf olt, %180, %181 : vector<1x128xf32>
      %183 = arith.extui %182 : vector<1x128xi1> to vector<1x128xi32>
      %184 = arith.sitofp %183 : vector<1x128xi32> to vector<1x128xf32>
      %185 = arith.addf %170, %184 : vector<1x128xf32>
      %cst_55 = arith.constant 1.000000e+00 : f32
      %186 = vector.broadcast %cst_55 : f32 to vector<1x128xf32>
      %187 = arith.subf %185, %186 : vector<1x128xf32>
      %cst_56 = arith.constant 0.000000e+00 : f32
      %188 = vector.broadcast %cst_56 : f32 to vector<1x128xf32>
      %189 = arith.maximumf %187, %188 : vector<1x128xf32>
      %cst_57 = arith.constant 2.500000e-01 : f32
      %190 = vector.broadcast %cst_57 : f32 to vector<1x128xf32>
      %191 = arith.mulf %189, %190 : vector<1x128xf32>
      %192 = arith.mulf %124, %191 : vector<1x128xf32>
      %193 = arith.addf %115, %192 : vector<1x128xf32>
      %cst_58 = arith.constant 1.000000e+00 : f32
      %194 = vector.broadcast %cst_58 : f32 to vector<1x128xf32>
      %195 = arith.addf %189, %194 : vector<1x128xf32>
      %cst_59 = arith.constant 2.500000e-01 : f32
      %196 = vector.broadcast %cst_59 : f32 to vector<1x128xf32>
      %197 = arith.mulf %195, %196 : vector<1x128xf32>
      %198 = arith.mulf %124, %197 : vector<1x128xf32>
      %199 = arith.addf %115, %198 : vector<1x128xf32>
      %200 = arith.select %123, %193, %115 : vector<1x128xi1>, vector<1x128xf32>
      %201 = arith.select %123, %199, %116 : vector<1x128xi1>, vector<1x128xf32>
      %202 = arith.select %118, %124, %39 : vector<1x128xf32>
      %203 = arith.subf %201, %200 : vector<1x128xf32>
      %204 = vector.shape_cast %203 : vector<1x128xf32> to vector<1x1x128xf32>
      %cst_60 = arith.constant dense<0xFF800000> : vector<1xf32>
      %205 = vector.multi_reduction <maximumf>, %204, %cst_60 [1, 2] : vector<1x1x128xf32> to vector<1xf32>
      %206 = vector.shape_cast %205 : vector<1xf32> to vector<1x1x1xf32>
      %207 = vector.extract %206[0, 0, 0] : f32 from vector<1x1x1xf32>
      %c2_i32 = arith.constant 2 : i32
      %208 = arith.addi %arg6, %c2_i32 : i32
      scf.yield %200, %201, %202, %208, %207 : vector<1x128xf32>, vector<1x128xf32>, vector<1x128xf32>, i32, f32
    }
    %19 = arith.subf %18#1, %18#0 : vector<1x128xf32>
    %cst_7 = arith.constant 9.99999974E-5 : f32
    %20 = vector.broadcast %cst_7 : f32 to vector<1x128xf32>
    %21 = arith.cmpf ole, %19, %20 : vector<1x128xf32>
    %22 = arith.select %21, %19, %18#2 : vector<1x128xi1>, vector<1x128xf32>
    %cst_8 = arith.constant 5.000000e-01 : f32
    %23 = vector.broadcast %cst_8 : f32 to vector<1x128xf32>
    %24 = arith.mulf %23, %22 : vector<1x128xf32>
    %25 = arith.addf %18#0, %24 : vector<1x128xf32>
    %26 = vector.broadcast %25 : vector<1x128xf32> to vector<16x128xf32>
    %27 = arith.addf %0, %26 : vector<16x128xf32>
    %cst_9 = arith.constant 5.000000e-01 : f32
    %28 = vector.broadcast %cst_9 : f32 to vector<16x128xf32>
    %29 = arith.mulf %28, %27 : vector<16x128xf32>
    %30 = math.tanh %29 : vector<16x128xf32>
    %cst_10 = arith.constant 5.000000e-01 : f32
    %31 = vector.broadcast %cst_10 : f32 to vector<16x128xf32>
    %32 = arith.mulf %31, %30 : vector<16x128xf32>
    %cst_11 = arith.constant 5.000000e-01 : f32
    %33 = vector.broadcast %cst_11 : f32 to vector<16x128xf32>
    %34 = arith.addf %32, %33 : vector<16x128xf32>
    %c0_12 = arith.constant 0 : index
    %c0_13 = arith.constant 0 : index
    %35 = vector.load %arg2[%c0_12, %c0_13] : memref<16x128xf32, #tpu.memory_space<vmem>>, vector<16x128xf32>
    tpu.vector_store %arg2[%c0_12, %c0_13], %34 {strides = array<i32>} : memref<16x128xf32, #tpu.memory_space<vmem>>, vector<16x128xf32>,
    return
  }
  func.func @transform_0(%arg0: i32) -> (i32, i32) {
    %c0_i32 = arith.constant 0 : i32
    %c0_i32_0 = arith.constant 0 : i32
    return %c0_i32, %arg0 : i32, i32
  }
  func.func @transform_1(%arg0: i32) -> (i32, i32) {
    %c0_i32 = arith.constant 0 : i32
    %c0_i32_0 = arith.constant 0 : i32
    return %c0_i32, %arg0 : i32, i32
  }
}

</mosaic_0001>

<bundles_post_ra>
// kernel: tpu_custom_call.1
= control target key start
LH: loop header
LB: loop body
LE: loop exit
PB: predicated region body
PF: predicated region fallthrough
CT: control target
= control target key end

     0   :  { %6 = vsyncpa [#allocation3], 0  ;;  %s654_s0 = inlined_call_operand.hbm [shape: f32[16,128], index: 0, kind: input, shape index: {}]   ;;  %s655_s1 = inlined_call_operand.hbm [shape: f32[16,128], index: 1, kind: output, shape index: {}]  }
   0x1   :  { %7 = vsyncpa [#allocation4], 0  ;;  %s497_s6 = smov [#allocation2]  }
   0x2   :  { %s13_s7 = sshll.u32 %s497_s6, 4  ;;  %s14_s7 = int_to_ptr.vmem [resolvable:$true] %s13_s7 }
   0x3   :  { %s413_s8 = scalar_lea.vmem %s14_s7, 256  ;;  %p418_p1 = scmp.lt.s32.totalorder %s14_s7, %s14_s7 }
   0x4   :  { %p414_p0 = scmp.ne.s32.totalorder %s14_s7, %s413_s8  ;;  %p419_p2 = scmp.lt.s32.totalorder %s413_s8, %s413_s8 }
   0x6   :  { %p420_p3 = por %p419_p2, %p418_p1 }
   0x8   :  { %p421_p4 = pnand %p420_p3, %p414_p0 }
   0xa   :  { %424 = shalt.err (!%p421_p4)
}
   0xb   :  { %s498_s9 = smov 128   ;;  %s499_s10 = smov 8  }
   0xc   :  { %19 = dma.hbm_to_vmem [thread:$0]  %s654_s0, 256, %s14_s7, [#allocation3], %s498_s9, %s498_s9, %s499_s10  }
   0xd   :  { %469 = dma.done.wait [#allocation3], 256  }
   0xe   :  { %470 = vsyncadd [#allocation3], 4294967040  ;;  %v518_v0 = vld [vmem:[#allocation2] sm:$0xff]  ;;  %v520_v1 = vld [vmem:[#allocation2 + $0x8] sm:$0xff] }
   0xf   :  { %v25_v2 = vmax.f32 %v518_v0, %v520_v1  ;;  %v34_v3 = vmin.f32 %v518_v0, %v520_v1 }
  0x11   :  { %v26_v4 = vrot.slane %v25_v2, 4  ;;  %v35_v5 = vrot.slane %v34_v3, 4 }
  0x13   :  { %v27_v6 = vmax.f32 %v25_v2, %v26_v4  ;;  %v36_v7 = vmin.f32 %v34_v3, %v35_v5 }
  0x15   :  { %v28_v8 = vrot.slane %v27_v6, 2  ;;  %v37_v9 = vrot.slane %v36_v7, 2 }
  0x17   :  { %v29_v10 = vmax.f32 %v27_v6, %v28_v8  ;;  %v38_v11 = vmin.f32 %v36_v7, %v37_v9 }
  0x19   :  { %v30_v12 = vrot.slane %v29_v10, 1  ;;  %v39_v13 = vrot.slane %v38_v11, 1 }
  0x1b   :  { %v31_v14 = vmax.f32 %v29_v10, %v30_v12  ;;  %v40_v15 = vmin.f32 %v38_v11, %v39_v13 }
  0x1d   :  { %v32_v16 = vsub.f32 0.0, %v31_v14  ;;  %v41_v17 = vsub.f32 0.0, %v40_v15 }
  0x1f   :  { %v300_v18 = vadd.f32 -7.0, %v32_v16   ;;  %v42_v19 = vadd.f32 7.0, %v41_v17  }
  0x21   :  { %v43_v20 = vsub.f32 %v42_v19, %v300_v18   ;;  %v656_v22 = vmov %v42_v19  ;;  %v657_v23 = vmov %v300_v18 }
  0x23   :  { %44 = vmax.xlane.f32.xlu0 %v43_v20 }
  0xac   :  { %v45_v21 = vpop.xlane.xlu0 %44 }
  0xad   :  { %312 = vpush %v45_v21 }
  0xde   :  { %s313_s0 = spop %312 }
  0xdf   :  { %p289_p5 = scmp.gt.f32.partialorder %s313_s0, 0.0001 }
  0xe0   :  { %s532_s13 = smov (%p289_p5), 0  }
  0xe1   :  { %291 = sbr.rel (!%p289_p5) target bundleno = 553 (0x229), region = 29 }
  0xe6 LB: > { %v549_v24 = vsub.f32 %v479_v19, %v483_v18  ;;  %s248_s14 = sadd.s32 2, %s475_s13   ;;  %v500_v22 = vmov 0.0   ;;  %s148_s15 = sadd.s32 1, %s475_s13  ;;  %v483_v18 = vphi %v300_v18, %v660_v18   ;;  %v479_v19 = vphi %v42_v19, %v659_v19   ;;  %s475_s13 = sphi %s532_s13, %s658_s13  }
  0xe7   : > { %p149_p6 = scmp.lt.s32.totalorder %s148_s15, 100  ;;  %p53_p7 = scmp.lt.s32.totalorder %s248_s14, 100 }
  0xe8   : > { %v61_v25 = vmul.f32 0.0, %v549_v24  ;;  %v80_v26 = vmul.f32 0.25, %v549_v24  ;;  %v99_v27 = vmul.f32 0.5, %v549_v24  ;;  %v118_v28 = vmul.f32 0.75, %v549_v24  ;;  %s658_s13 = smov %s248_s14 }
  0xe9   : > { %vm60_vm4 = vcmp.gt.f32.partialorder %v549_v24, 0.0001  ;;  %s152_s16 = scalar_select %p149_p6, 1, 0 }
  0xea   : > { %v62_v29 = vadd.f32 %v483_v18, %v61_v25  ;;  %v81_v30 = vadd.f32 %v483_v18, %v80_v26  ;;  %v100_v31 = vadd.f32 %v483_v18, %v99_v27  ;;  %v119_v32 = vadd.f32 %v483_v18, %v118_v28 }
  0xec   : > { %v63_v33 = vadd.f32 %v62_v29, %v518_v0  ;;  %v64_v34 = vadd.f32 %v62_v29, %v520_v1  ;;  %v82_v35 = vadd.f32 %v81_v30, %v518_v0  ;;  %v83_v36 = vadd.f32 %v81_v30, %v520_v1 }
  0xed   : > { %v101_v37 = vadd.f32 %v100_v31, %v518_v0  ;;  %v102_v38 = vadd.f32 %v100_v31, %v520_v1  ;;  %v120_v42 = vadd.f32 %v119_v32, %v518_v0  ;;  %v121_v44 = vadd.f32 %v119_v32, %v520_v1 }
  0xee   : > { %v65_v39 = vmul.f32 0.5, %v63_v33  ;;  %v66_v40 = vmul.f32 0.5, %v64_v34  ;;  %v84_v41 = vmul.f32 0.5, %v82_v35  ;;  %v85_v43 = vmul.f32 0.5, %v83_v36 }
  0xef   : > { %v103_v45 = vmul.f32 0.5, %v101_v37  ;;  %v104_v46 = vmul.f32 0.5, %v102_v38  ;;  %v122_v47 = vmul.f32 0.5, %v120_v42  ;;  %v123_v48 = vmul.f32 0.5, %v121_v44 }
  0xf0   : > { %369 = vtanh.f32 %v65_v39 }
  0xf1   : > { %371 = vtanh.f32 %v66_v40 }
  0xf2   : > { %373 = vtanh.f32 %v84_v41 }
  0xf3   : > { %375 = vtanh.f32 %v85_v43 }
  0xf4   : > { %377 = vtanh.f32 %v103_v45  ;;  %v584_v45 = vstv %s152_s16 }
  0xf5   : > { %379 = vtanh.f32 %v104_v46  ;;  %vm154_vm5 = vcmp.eq.s32.totalorder %v584_v45, 1 }
  0xf6   : > { %381 = vtanh.f32 %v122_v47 }
  0xf7   : > { %383 = vtanh.f32 %v123_v48 }
  0xfd   : > { %v370_v49 = vpop.eup %369 }
  0xfe   : > { %v372_v50 = vpop.eup %371 }
  0xff   : > { %v374_v51 = vpop.eup %373  ;;  %v69_v52 = vadd.f32 %v372_v50, %v370_v49 }
 0x100   : > { %v376_v53 = vpop.eup %375 }
 0x101   : > { %v378_v54 = vpop.eup %377  ;;  %v70_v55 = vrot.slane %v69_v52, 4  ;;  %v88_v56 = vadd.f32 %v376_v53, %v374_v51 }
 0x102   : > { %v380_v57 = vpop.eup %379 }
 0x103   : > { %v382_v58 = vpop.eup %381  ;;  %v71_v59 = vadd.f32 %v70_v55, %v69_v52  ;;  %v89_v60 = vrot.slane %v88_v56, 4  ;;  %v107_v61 = vadd.f32 %v380_v57, %v378_v54 }
 0x104   : > { %v384_v62 = vpop.eup %383 }
 0x105   : > { %v72_v63 = vrot.slane %v71_v59, 2  ;;  %v90_v2 = vadd.f32 %v89_v60, %v88_v56  ;;  %v108_v3 = vrot.slane %v107_v61, 4  ;;  %v126_v4 = vadd.f32 %v384_v62, %v382_v58 }
 0x107   : > { %v73_v5 = vadd.f32 %v72_v63, %v71_v59  ;;  %v91_v6 = vrot.slane %v90_v2, 2  ;;  %v109_v7 = vadd.f32 %v108_v3, %v107_v61  ;;  %v127_v8 = vrot.slane %v126_v4, 4 }
 0x109   : > { %v74_v9 = vrot.slane %v73_v5, 1  ;;  %v92_v10 = vadd.f32 %v91_v6, %v90_v2  ;;  %v110_v11 = vrot.slane %v109_v7, 2  ;;  %v128_v12 = vadd.f32 %v127_v8, %v126_v4 }
 0x10b   : > { %v75_v13 = vadd.f32 %v74_v9, %v73_v5  ;;  %v93_v14 = vrot.slane %v92_v10, 1  ;;  %v111_v15 = vadd.f32 %v110_v11, %v109_v7  ;;  %v129_v16 = vrot.slane %v128_v12, 2 }
 0x10d   : > { %vm76_vm0 = vcmp.lt.f32.partialorder %v75_v13, -10.0  ;;  %v94_v17 = vadd.f32 %v93_v14, %v92_v10  ;;  %v112_v20 = vrot.slane %v111_v15, 1  ;;  %v130_v21 = vadd.f32 %v129_v16, %v128_v12 }
 0x10e   : > { %v302_v23 = vsel %vm76_vm0, 1.0, %v500_v22 }
 0x10f   : > { %vm95_vm1 = vcmp.lt.f32.partialorder %v94_v17, -10.0  ;;  %v113_v25 = vadd.f32 %v112_v20, %v111_v15  ;;  %v131_v26 = vrot.slane %v130_v21, 1 }
 0x110   : > { %v303_v27 = vsel %vm95_vm1, 1.0, %v500_v22 }
 0x111   : > { %v98_v28 = vadd.f32 %v303_v27, %v302_v23  ;;  %vm114_vm2 = vcmp.lt.f32.partialorder %v113_v25, -10.0  ;;  %v132_v29 = vadd.f32 %v131_v26, %v130_v21 }
 0x112   : > { %v304_v30 = vsel %vm114_vm2, 1.0, %v500_v22 }
 0x113   : > { %v117_v31 = vadd.f32 %v304_v30, %v98_v28  ;;  %vm133_vm3 = vcmp.lt.f32.partialorder %v132_v29, -10.0 }
 0x114   : > { %v305_v32 = vsel %vm133_vm3, 1.0, %v500_v22 }
 0x115   : > { %v136_v33 = vadd.f32 %v305_v32, %v117_v31 }
 0x117   : > { %v306_v34 = vadd.f32 -1.0, %v136_v33 }
 0x119   : > { %v138_v35 = vmax.f32 %v306_v34, 0.0 }
 0x11b   : > { %v139_v36 = vmul.f32 0.25, %v138_v35  ;;  %v142_v37 = vadd.f32 1.0, %v138_v35 }
 0x11d   : > { %v140_v38 = vmul.f32 %v139_v36, %v549_v24  ;;  %v143_v39 = vmul.f32 0.25, %v142_v37 }
 0x11f   : > { %v141_v40 = vadd.f32 %v483_v18, %v140_v38  ;;  %v144_v41 = vmul.f32 %v143_v39, %v549_v24 }
 0x121   : > { %v145_v42 = vadd.f32 %v483_v18, %v144_v41  ;;  %v579_v43 = vsel %vm60_vm4, %v141_v40, %v483_v18 }
 0x123   : > { %v582_v44 = vsel %vm60_vm4, %v145_v42, %v479_v19 }
 0x124   : > { %v588_v46 = vsub.f32 %v582_v44, %v579_v43 }
 0x126   : > { %v156_v47 = vmul.f32 0.0, %v588_v46  ;;  %v175_v48 = vmul.f32 0.25, %v588_v46  ;;  %v194_v49 = vmul.f32 0.5, %v588_v46  ;;  %v213_v18 = vmul.f32 0.75, %v588_v46 }
 0x127   : > { %v599_v20 = vsel %vm154_vm5, %v588_v46, %v549_v24   ;;  %vm151_vm10 = vcmp.gt.f32.partialorder %v588_v46, 0.0001 }
 0x128   : > { %v157_v19 = vadd.f32 %v156_v47, %v579_v43  ;;  %v176_v50 = vadd.f32 %v175_v48, %v579_v43  ;;  %v195_v51 = vadd.f32 %v194_v49, %v579_v43  ;;  %v214_v52 = vadd.f32 %v213_v18, %v579_v43  ;;  %vm155_vm11 = vmand %vm151_vm10, %vm154_vm5 }
 0x12a   : > { %v158_v53 = vadd.f32 %v157_v19, %v518_v0  ;;  %v159_v54 = vadd.f32 %v157_v19, %v520_v1  ;;  %v177_v55 = vadd.f32 %v176_v50, %v518_v0  ;;  %v178_v56 = vadd.f32 %v176_v50, %v520_v1 }
 0x12b   : > { %v196_v57 = vadd.f32 %v195_v51, %v518_v0  ;;  %v197_v24 = vadd.f32 %v195_v51, %v520_v1  ;;  %v215_v61 = vadd.f32 %v214_v52, %v518_v0  ;;  %v216_v63 = vadd.f32 %v214_v52, %v520_v1 }
 0x12c   : > { %v160_v58 = vmul.f32 0.5, %v158_v53  ;;  %v161_v59 = vmul.f32 0.5, %v159_v54  ;;  %v179_v60 = vmul.f32 0.5, %v177_v55  ;;  %v180_v62 = vmul.f32 0.5, %v178_v56 }
 0x12d   : > { %v198_v2 = vmul.f32 0.5, %v196_v57  ;;  %v199_v3 = vmul.f32 0.5, %v197_v24  ;;  %v217_v4 = vmul.f32 0.5, %v215_v61  ;;  %v218_v5 = vmul.f32 0.5, %v216_v63 }
 0x12e   : > { %385 = vtanh.f32 %v160_v58 }
 0x12f   : > { %387 = vtanh.f32 %v161_v59 }
 0x130   : > { %389 = vtanh.f32 %v179_v60 }
 0x131   : > { %391 = vtanh.f32 %v180_v62 }
 0x132   : > { %393 = vtanh.f32 %v198_v2 }
 0x133   : > { %395 = vtanh.f32 %v199_v3 }
 0x134   : > { %397 = vtanh.f32 %v217_v4 }
 0x135   : > { %399 = vtanh.f32 %v218_v5 }
 0x13b   : > { %v386_v6 = vpop.eup %385 }
 0x13c   : > { %v388_v7 = vpop.eup %387 }
 0x13d   : > { %v390_v8 = vpop.eup %389  ;;  %v164_v9 = vadd.f32 %v388_v7, %v386_v6 }
 0x13e   : > { %v392_v10 = vpop.eup %391 }
 0x13f   : > { %v394_v11 = vpop.eup %393  ;;  %v165_v12 = vrot.slane %v164_v9, 4  ;;  %v183_v13 = vadd.f32 %v392_v10, %v390_v8 }
 0x140   : > { %v396_v14 = vpop.eup %395 }
 0x141   : > { %v398_v15 = vpop.eup %397  ;;  %v166_v16 = vadd.f32 %v165_v12, %v164_v9  ;;  %v184_v17 = vrot.slane %v183_v13, 4  ;;  %v202_v21 = vadd.f32 %v396_v14, %v394_v11 }
 0x142   : > { %v400_v23 = vpop.eup %399 }
 0x143   : > { %v167_v25 = vrot.slane %v166_v16, 2  ;;  %v185_v26 = vadd.f32 %v184_v17, %v183_v13  ;;  %v203_v27 = vrot.slane %v202_v21, 4  ;;  %v221_v28 = vadd.f32 %v400_v23, %v398_v15 }
 0x145   : > { %v168_v29 = vadd.f32 %v167_v25, %v166_v16  ;;  %v186_v30 = vrot.slane %v185_v26, 2  ;;  %v204_v31 = vadd.f32 %v203_v27, %v202_v21  ;;  %v222_v32 = vrot.slane %v221_v28, 4 }
 0x147   : > { %v169_v33 = vrot.slane %v168_v29, 1  ;;  %v187_v34 = vadd.f32 %v186_v30, %v185_v26  ;;  %v205_v35 = vrot.slane %v204_v31, 2  ;;  %v223_v36 = vadd.f32 %v222_v32, %v221_v28 }
 0x149   : > { %v170_v37 = vadd.f32 %v169_v33, %v168_v29  ;;  %v188_v38 = vrot.slane %v187_v34, 1  ;;  %v206_v39 = vadd.f32 %v205_v35, %v204_v31  ;;  %v224_v40 = vrot.slane %v223_v36, 2 }
 0x14b   : > { %vm171_vm6 = vcmp.lt.f32.partialorder %v170_v37, -10.0  ;;  %v189_v41 = vadd.f32 %v188_v38, %v187_v34  ;;  %v207_v42 = vrot.slane %v206_v39, 1  ;;  %v225_v47 = vadd.f32 %v224_v40, %v223_v36 }
 0x14c   : > { %v307_v48 = vsel %vm171_vm6, 1.0, %v500_v22 }
 0x14d   : > { %vm190_vm7 = vcmp.lt.f32.partialorder %v189_v41, -10.0  ;;  %v208_v49 = vadd.f32 %v207_v42, %v206_v39  ;;  %v226_v18 = vrot.slane %v225_v47, 1 }
 0x14e   : > { %v308_v19 = vsel %vm190_vm7, 1.0, %v500_v22 }
 0x14f   : > { %v193_v50 = vadd.f32 %v308_v19, %v307_v48  ;;  %vm209_vm8 = vcmp.lt.f32.partialorder %v208_v49, -10.0  ;;  %v227_v51 = vadd.f32 %v226_v18, %v225_v47 }
 0x150   : > { %v309_v52 = vsel %vm209_vm8, 1.0, %v500_v22 }
 0x151   : > { %v212_v53 = vadd.f32 %v309_v52, %v193_v50  ;;  %vm228_vm9 = vcmp.lt.f32.partialorder %v227_v51, -10.0 }
 0x152   : > { %v310_v54 = vsel %vm228_vm9, 1.0, %v500_v22 }
 0x153   : > { %v231_v55 = vadd.f32 %v310_v54, %v212_v53 }
 0x155   : > { %v311_v56 = vadd.f32 -1.0, %v231_v55 }
 0x157   : > { %v233_v57 = vmax.f32 %v311_v56, 0.0 }
 0x159   : > { %v234_v24 = vmul.f32 0.25, %v233_v57  ;;  %v237_v58 = vadd.f32 1.0, %v233_v57 }
 0x15b   : > { %v235_v59 = vmul.f32 %v234_v24, %v588_v46  ;;  %v238_v60 = vmul.f32 0.25, %v237_v58 }
 0x15d   : > { %v236_v61 = vadd.f32 %v235_v59, %v579_v43  ;;  %v239_v62 = vmul.f32 %v238_v60, %v588_v46 }
 0x15f   : > { %v240_v63 = vadd.f32 %v239_v62, %v579_v43  ;;  %v241_v2 = vsel %vm155_vm11, %v236_v61, %v579_v43  }
 0x160   : > { %v660_v18 = vmov %v241_v2 }
 0x161   : > { %v242_v22 = vsel %vm155_vm11, %v240_v63, %v582_v44  }
 0x162   : > { %v244_v3 = vsub.f32 %v242_v22, %v241_v2  ;;  %v659_v19 = vmov %v242_v22 }
 0x164   : > { %245 = vmax.xlane.f32.xlu0 %v244_v3 }
 0x1ed   : > { %v246_v4 = vpop.xlane.xlu0 %245 }
 0x1ee   : > { %314 = vpush %v246_v4 }
 0x21f   : > { %s315_s17 = spop %314 }
 0x220   : > { %p54_p8 = scmp.gt.f32.partialorder %s315_s17, 0.0001 }
 0x222   : > { %p55_p9 = pnand %p54_p8, %p53_p7 }
 0x223   :  { %v661_v23 = vmov (%p55_p9), %v241_v2 }
 0x224   :  { %58 = sbr.rel (!%p55_p9) target bundleno = 230 (0xe6), region = 35 }
 0x229 PF:  { %v249_v43 = vsub.f32 %v491_v22, %v495_v23  ;;  %s501_s18 = smov [#allocation5]   ;;  %v495_v23 = vphi %v657_v23, %v661_v23   ;;  %v491_v22 = vphi %v656_v22, %v242_v22   ;;  %v487_v20 = vphi %v43_v20, %v599_v20  }
 0x22a   :  { %s271_s19 = sshll.u32 %s501_s18, 4  ;;  %s272_s19 = int_to_ptr.vmem [resolvable:$true] %s271_s19 }
 0x22b   :  { %vm250_vm12 = vcmp.le.f32.partialorder %v249_v43, 0.0001  ;;  %s425_s20 = scalar_lea.vmem %s272_s19, 256  ;;  %p430_p11 = scmp.lt.s32.totalorder %s272_s19, %s272_s19 }
 0x22c   :  { %v251_v44 = vsel %vm250_vm12, %v249_v43, %v487_v20  ;;  %p426_p10 = scmp.ne.s32.totalorder %s272_s19, %s425_s20  ;;  %p431_p12 = scmp.lt.s32.totalorder %s425_s20, %s425_s20 }
 0x22d   :  { %v252_v45 = vmul.f32 0.5, %v251_v44 }
 0x22e   :  { %p432_p13 = por %p431_p12, %p430_p11 }
 0x22f   :  { %v253_v46 = vadd.f32 %v495_v23, %v252_v45 }
 0x230   :  { %p433_p0 = pnand %p432_p13, %p426_p10 }
 0x231   :  { %v254_v5 = vadd.f32 %v253_v46, %v518_v0  ;;  %v255_v6 = vadd.f32 %v253_v46, %v520_v1 }
 0x233   :  { %v256_v7 = vmul.f32 0.5, %v254_v5  ;;  %v257_v8 = vmul.f32 0.5, %v255_v6 }
 0x235   :  { %401 = vtanh.f32 %v256_v7 }
 0x236   :  { %403 = vtanh.f32 %v257_v8 }
 0x242   :  { %v402_v9 = vpop.eup %401 }
 0x243   :  { %v404_v10 = vpop.eup %403  ;;  %v260_v11 = vmul.f32 0.5, %v402_v9 }
 0x244   :  { %v261_v12 = vmul.f32 0.5, %v404_v10 }
 0x245   :  { %v262_v13 = vadd.f32 0.5, %v260_v11 }
 0x246   :  { %v263_v14 = vadd.f32 0.5, %v261_v12 }
 0x247   :  { %264 = vst [vmem:[#allocation5] sm:$0xff] %v262_v13 }
 0x248   :  { %265 = vst [vmem:[#allocation5 + $0x8] sm:$0xff] %v263_v14 }
 0x249   :  { %436 = shalt.err (!%p433_p0)
}
 0x24a   :  { %277 = dma.vmem_to_hbm [thread:$0]  %s272_s19, 256, %s655_s1, [#allocation4], %s498_s9, %s498_s9, %s499_s10  }
 0x24b   :  { %471 = dma.done.wait [#allocation4], 256  }
 0x24c   :  { %472 = vsyncadd [#allocation4], 4294967040 }
 0x24d   :  { %281 = vsyncpa [#allocation3], 1 }
 0x24e   :  { %282 = vsyncpa [#allocation4], 1 }

</bundles_post_ra>
